<compile_context>
chip_gen: v5e
topology: v5e:2x2
jax: 0.10.0
libtpu: 0.0.40
codegen_flags: <defaults>
</compile_context>

<pallas_src>
import functools
import math

import jax
import jax.numpy as jnp
from jax.experimental import pallas as pl
from jax.experimental.pallas import tpu as pltpu


# ----------------------------------------------------------------------------
# Pallas kernel
# ----------------------------------------------------------------------------
def _layer_norm_kernel(x_ref, g_ref, b_ref, o_ref, *, eps, d_valid, d_pad):
    # Load in native dtype, upcast to f32 for the statistics.
    x = x_ref[...].astype(jnp.float32)                    # (rows, D_pad)

    if d_valid != d_pad:
        lane = jax.lax.broadcasted_iota(jnp.int32, x.shape, dimension=1)
        valid = lane < d_valid
        x = jnp.where(valid, x, 0.0)

    # mean over the real feature lanes (padding contributes 0 to the sum)
    mean = jnp.sum(x, axis=-1, keepdims=True) * (1.0 / d_valid)
    xm = x - mean
    if d_valid != d_pad:
        xm = jnp.where(valid, xm, 0.0)

    # biased variance (PyTorch var(unbiased=False))
    var = jnp.sum(xm * xm, axis=-1, keepdims=True) * (1.0 / d_valid)
    inv = jax.lax.rsqrt(var + eps)                         # EUP

    y = (xm * inv) * g_ref[...].astype(jnp.float32) + b_ref[...].astype(jnp.float32)
    o_ref[...] = y.astype(o_ref.dtype)                     # store in native dtype


# ----------------------------------------------------------------------------
# Block-size selection (VMEM-aware, generation-agnostic)
# ----------------------------------------------------------------------------
def _pick_block_rows(M, d_pad, itemsize):
    # Target ~2 MiB of input per tile; measured Pallas data shows ~85% of the
    # HBM roofline at 1-4 MiB tiles vs ~29% at 128-row tiles.
    target_in_bytes = 2 << 20

    # Keep double-buffered (input + output) tiles conservatively under 24 MiB
    # so the kernel fits v7x's 64 MiB physical / 32 MiB scoped VMEM too.
    try:
        vmem_cap = pltpu.get_tpu_info().vmem_capacity_bytes
    except Exception:  # pragma: no cover - older jax / non-TPU tracing
        vmem_cap = 64 << 20
    vmem_budget = min(24 << 20, vmem_cap // 2)

    bytes_per_row_in = d_pad * itemsize
    bytes_per_row_io = 2 * bytes_per_row_in                # input + output tile
    rows_by_target = (target_in_bytes // bytes_per_row_in) // 8 * 8
    rows_by_vmem = (vmem_budget // (2 * bytes_per_row_io)) // 8 * 8
    br = max(8, min(rows_by_target, rows_by_vmem))

    if M > 8:
        # Keep at least 2 grid steps so v7x's two TensorCores both get work.
        half = -(-M // 2)                  # cdiv(M, 2)
        half = -(-half // 8) * 8           # round up to a multiple of 8
        br = max(8, min(br, half))

    if br >= M:
        br = M                             # single full-extent block (allowed)
    return br


# ----------------------------------------------------------------------------
# Wrapper
# ----------------------------------------------------------------------------
def layer_norm(x, gamma, beta, eps=1e-12):
    """LayerNorm over the last dim of `x` (any leading shape, dtype-preserving)."""
    orig_shape = x.shape
    orig_dtype = x.dtype
    D = orig_shape[-1]
    M = int(math.prod(orig_shape[:-1])) if len(orig_shape) > 1 else 1

    # Lane-dense feature axis: pad D up to a multiple of 128 if needed.
    D_pad = -(-D // 128) * 128
    x2 = x.reshape(M, D)
    g2 = gamma.reshape(1, D).astype(jnp.float32)
    b2 = beta.reshape(1, D).astype(jnp.float32)
    if D_pad != D:
        # TODO(synk): padding is a wrapper-side HBM pass; only taken for ragged D.
        x2 = jnp.pad(x2, ((0, 0), (0, D_pad - D)))
        g2 = jnp.pad(g2, ((0, 0), (0, D_pad - D)))
        b2 = jnp.pad(b2, ((0, 0), (0, D_pad - D)))

    itemsize = jnp.dtype(orig_dtype).itemsize
    block_rows = _pick_block_rows(M, D_pad, itemsize)
    grid = (pl.cdiv(M, block_rows),)

    # Double-buffered in+out tiles (+ params) with a little headroom; raise the
    # scoped VMEM limit explicitly (v5e default is only 16 MiB).
    footprint = 2 * block_rows * D_pad * 2 * itemsize + 4 * D_pad * 4 * 2
    vmem_limit = int(min(48 << 20, max(32 << 20, footprint + (8 << 20))))

    cost = pl.CostEstimate(
        flops=8 * M * D,                          # sub, sq, sums, scale, shift
        transcendentals=M,                        # one rsqrt per row
        bytes_accessed=2 * M * D * itemsize + 2 * D * 4,
    )

    out = pl.pallas_call(
        functools.partial(_layer_norm_kernel, eps=eps, d_valid=D, d_pad=D_pad),
        out_shape=jax.ShapeDtypeStruct((M, D_pad), orig_dtype),
        grid=grid,
        in_specs=[
            pl.BlockSpec((block_rows, D_pad), lambda i: (i, 0)),   # x rows
            pl.BlockSpec((1, D_pad), lambda i: (0, 0)),            # gamma
            pl.BlockSpec((1, D_pad), lambda i: (0, 0)),            # beta
        ],
        out_specs=pl.BlockSpec((block_rows, D_pad), lambda i: (i, 0)),
        compiler_params=pltpu.CompilerParams(
            dimension_semantics=("parallel",),
            vmem_limit_bytes=vmem_limit,
        ),
        cost_estimate=cost,
    )(x2, g2, b2)

    if D_pad != D:
        out = out[:, :D]
    return out.reshape(orig_shape)


# Pure-JAX reference (mirrors the PyTorch module exactly, in f32).
def layer_norm_ref(x, gamma, beta, eps=1e-12):
    x = x.astype(jnp.float32)
    mean = jnp.mean(x, axis=-1, keepdims=True)
    var = jnp.mean((x - mean) ** 2, axis=-1, keepdims=True)   # unbiased=False
    out = (x - mean) / jnp.sqrt(var + eps)
    return gamma.astype(jnp.float32) * out + beta.astype(jnp.float32)


# ----------------------------------------------------------------------------
# Main
# ----------------------------------------------------------------------------
if __name__ == "__main__":
    key = jax.random.PRNGKey(0)
    k_x, k_g, k_b = jax.random.split(key, 3)

    # Case 1: lane-dense D, f32 (batch=2, seq=8, d_model=256)
    batch, seq, d_model = 2, 8, 256
    x = jax.random.normal(k_x, (batch, seq, d_model), dtype=jnp.float32)
    gamma = 1.0 + 0.1 * jax.random.normal(k_g, (d_model,), dtype=jnp.float32)
    beta = 0.1 * jax.random.normal(k_b, (d_model,), dtype=jnp.float32)

    out = jax.block_until_ready(layer_norm(x, gamma, beta))
    ref = layer_norm_ref(x, gamma, beta)
    assert out.shape == x.shape and out.dtype == x.dtype
    assert bool(jnp.all(jnp.isfinite(out)))
    assert bool(jnp.max(jnp.abs(out - ref)) < 1e-4), float(jnp.max(jnp.abs(out - ref)))

    # Case 2: ragged D (not multiple of 128) and ragged M, f32
    x2 = jax.random.normal(k_x, (3, 7, 96), dtype=jnp.float32)
    g2 = 1.0 + 0.1 * jax.random.normal(k_g, (96,), dtype=jnp.float32)
    b2 = 0.1 * jax.random.normal(k_b, (96,), dtype=jnp.float32)
    out2 = jax.block_until_ready(layer_norm(x2, g2, b2))
    ref2 = layer_norm_ref(x2, g2, b2)
    assert out2.shape == x2.shape and out2.dtype == x2.dtype
    assert bool(jnp.max(jnp.abs(out2 - ref2)) < 1e-4), float(jnp.max(jnp.abs(out2 - ref2)))

    # Case 3: native bf16 I/O (dtype-preserving, half the HBM traffic)
    xb = x.astype(jnp.bfloat16)
    outb = jax.block_until_ready(layer_norm(xb, gamma, beta))
    refb = layer_norm_ref(xb, gamma, beta)
    assert outb.dtype == jnp.bfloat16 and outb.shape == xb.shape
    assert bool(jnp.max(jnp.abs(outb.astype(jnp.float32) - refb)) < 5e-2)

    print("KERNEL_OK")
</pallas_src>

<mosaic_0001>
module attributes {stable_mosaic.version = 11 : i64} {
  func.func @_layer_norm_kernel(%arg0: i32, %arg1: memref<8x256xf32, #tpu.memory_space<vmem>>, %arg2: memref<1x256xf32, #tpu.memory_space<vmem>>, %arg3: memref<1x256xf32, #tpu.memory_space<vmem>>, %arg4: memref<8x256xf32, #tpu.memory_space<vmem>>) attributes {dimension_semantics = [#tpu.dimension_semantics<parallel>], iteration_bounds = array<i64: 2>, scalar_prefetch = 0 : i64, scratch_operands = 0 : i64, tpu.core_type = #tpu.core_type<tc>, window_params = [{transform_indices = @transform_0, window_bounds = array<i64: 8, 256>}, {pipeline_mode = #tpu.pipeline_mode<synchronous>, transform_indices = @transform_1, window_bounds = array<i64: 1, 256>}, {pipeline_mode = #tpu.pipeline_mode<synchronous>, transform_indices = @transform_2, window_bounds = array<i64: 1, 256>}, {transform_indices = @transform_3, window_bounds = array<i64: 8, 256>}]} {
    %c0 = arith.constant 0 : index
    %c0_0 = arith.constant 0 : index
    %0 = vector.load %arg1[%c0, %c0_0] : memref<8x256xf32, #tpu.memory_space<vmem>>, vector<8x256xf32>
    %cst = arith.constant dense<0.000000e+00> : vector<8xf32>
    %1 = vector.multi_reduction <add>, %0, %cst [1] : vector<8x256xf32> to vector<8xf32>
    %2 = vector.shape_cast %1 : vector<8xf32> to vector<8x1xf32>
    %cst_1 = arith.constant 3.906250e-03 : f32
    %3 = vector.broadcast %cst_1 : f32 to vector<8x1xf32>
    %4 = arith.mulf %2, %3 : vector<8x1xf32>
    %5 = vector.broadcast %4 : vector<8x1xf32> to vector<8x256xf32>
    %6 = arith.subf %0, %5 : vector<8x256xf32>
    %7 = arith.mulf %6, %6 : vector<8x256xf32>
    %cst_2 = arith.constant dense<0.000000e+00> : vector<8xf32>
    %8 = vector.multi_reduction <add>, %7, %cst_2 [1] : vector<8x256xf32> to vector<8xf32>
    %9 = vector.shape_cast %8 : vector<8xf32> to vector<8x1xf32>
    %cst_3 = arith.constant 3.906250e-03 : f32
    %10 = vector.broadcast %cst_3 : f32 to vector<8x1xf32>
    %11 = arith.mulf %9, %10 : vector<8x1xf32>
    %cst_4 = arith.constant 9.99999996E-13 : f32
    %12 = vector.broadcast %cst_4 : f32 to vector<8x1xf32>
    %13 = arith.addf %11, %12 : vector<8x1xf32>
    %14 = math.rsqrt %13 : vector<8x1xf32>
    %15 = vector.broadcast %14 : vector<8x1xf32> to vector<8x256xf32>
    %16 = arith.mulf %6, %15 : vector<8x256xf32>
    %c0_5 = arith.constant 0 : index
    %c0_6 = arith.constant 0 : index
    %17 = vector.load %arg2[%c0_5, %c0_6] : memref<1x256xf32, #tpu.memory_space<vmem>>, vector<1x256xf32>
    %18 = vector.broadcast %17 : vector<1x256xf32> to vector<8x256xf32>
    %19 = arith.mulf %16, %18 : vector<8x256xf32>
    %c0_7 = arith.constant 0 : index
    %c0_8 = arith.constant 0 : index
    %20 = vector.load %arg3[%c0_7, %c0_8] : memref<1x256xf32, #tpu.memory_space<vmem>>, vector<1x256xf32>
    %21 = vector.broadcast %20 : vector<1x256xf32> to vector<8x256xf32>
    %22 = arith.addf %19, %21 : vector<8x256xf32>
    %c0_9 = arith.constant 0 : index
    %c0_10 = arith.constant 0 : index
    %23 = vector.load %arg4[%c0_9, %c0_10] : memref<8x256xf32, #tpu.memory_space<vmem>>, vector<8x256xf32>
    tpu.vector_store %arg4[%c0_9, %c0_10], %22 {strides = array<i32>} : memref<8x256xf32, #tpu.memory_space<vmem>>, vector<8x256xf32>,
    return
  }
  func.func @transform_0(%arg0: i32) -> (i32, i32) {
    %c0_i32 = arith.constant 0 : i32
    %c0_i32_0 = arith.constant 0 : i32
    return %arg0, %c0_i32 : i32, i32
  }
  func.func @transform_1(%arg0: i32) -> (i32, i32) {
    %c0_i32 = arith.constant 0 : i32
    %c0_i32_0 = arith.constant 0 : i32
    %c0_i32_1 = arith.constant 0 : i32
    return %c0_i32, %c0_i32_0 : i32, i32
  }
  func.func @transform_2(%arg0: i32) -> (i32, i32) {
    %c0_i32 = arith.constant 0 : i32
    %c0_i32_0 = arith.constant 0 : i32
    %c0_i32_1 = arith.constant 0 : i32
    return %c0_i32, %c0_i32_0 : i32, i32
  }
  func.func @transform_3(%arg0: i32) -> (i32, i32) {
    %c0_i32 = arith.constant 0 : i32
    %c0_i32_0 = arith.constant 0 : i32
    return %arg0, %c0_i32 : i32, i32
  }
}

</mosaic_0001>

<bundles_post_ra>
// kernel: tpu_custom_call.1
= control target key start
LH: loop header
LB: loop body
LE: loop exit
PB: predicated region body
PF: predicated region fallthrough
CT: control target
= control target key end

     0   :  { %8 = vsyncpa [#allocation3], 0  ;;  %s787_s0 = inlined_call_operand.hbm [shape: f32[16,256], index: 0, kind: input, shape index: {}]   ;;  %s788_s1 = inlined_call_operand.hbm [shape: f32[1,256], index: 1, kind: input, shape index: {}]   ;;  %s789_s2 = inlined_call_operand.hbm [shape: f32[1,256], index: 2, kind: input, shape index: {}]   ;;  %s790_s3 = inlined_call_operand.hbm [shape: f32[16,256], index: 3, kind: output, shape index: {}]  }
   0x1   :  { %10 = vsyncpa [#allocation3 + $0x1], 0 }
   0x2   :  { %11 = vsyncpa [#allocation6], 0 }
   0x3   :  { %12 = vsyncpa [#allocation4], 0 }
   0x4   :  { %14 = vsyncpa [#allocation4 + $0x1], 0  ;;  %s642_s12 = smov 0   ;;  %s644_s13 = smov 0  }
   0x5   :  { %s646_s14 = smov 0   ;;  %s648_s15 = smov 0  }
   0x6 LB: > { %s663_s16 = sadd.s32 4294967295, %s618_s15   ;;  %s369_s17 = sadd.s32 4294967294, %s618_s15   ;;  %s618_s15 = sphi %s648_s15, %s800_s15   ;;  %s614_s14 = sphi %s646_s14, %s799_s14   ;;  %s610_s13 = sphi %s644_s13, %s798_s13   ;;  %s606_s12 = sphi %s642_s12, %s797_s12  }
   0x7   : > { %p40_p0 = scmp.ne.s32.totalorder %s610_s13, %s606_s12  ;;  %p41_p1 = scmp.eq.s32.totalorder %s663_s16, 0 }
   0x8   : > { %p106_p2 = scmp.eq.s32.totalorder %s663_s16, 1  ;;  %p112_p3 = scmp.eq.s32.totalorder %s369_s17, 1 }
   0x9   : > { %p672_p4 = por %p41_p1, %p40_p0  ;;  %p370_p5 = scmp.ge.s32.totalorder %s618_s15, 1 }
   0xa   : > { %p677_p6 = por %p112_p3, %p40_p0  ;;  %p119_p7 = scmp.lt.s32.totalorder %s618_s15, 3 }
   0xb   : > { %s131_s22 = sshll.u32 %s788_s1, 4  ;;  %s620_s24 = smov [#allocation5]   ;;  %s132_s22 = int_to_ptr.hbm [resolvable:$true] %s131_s22 }
   0xc   : > { %p685_p8 = pnand %p370_p5, %p119_p7  ;;  %s133_s25 = sshll.u32 %s620_s24, 4  ;;  %s134_s25 = int_to_ptr.vmem [resolvable:$true] %s133_s25 }
   0xd   : > { %s143_s28 = sshll.u32 %s789_s2, 4  ;;  %s621_s29 = smov [#allocation7]   ;;  %s144_s28 = int_to_ptr.hbm [resolvable:$true] %s143_s28 }
   0xe   : > { %p401_p10 = pneg %p685_p8  ;;  %s145_s30 = sshll.u32 %s621_s29, 4  ;;  %s146_s30 = int_to_ptr.vmem [resolvable:$true] %s145_s30 }
   0xf   : > { %s698_s4 = sadd.s32 1, %s618_s15   ;;  %s27_s5 = sadd.s32 1, %s614_s14 }
  0x10   : > { %p402_p11 = pnand %p401_p10, %p41_p1  ;;  %s24_s6 = ssub.s32 %s618_s15, %s698_s4 }
  0x11   : > { %p34_p12 = scmp.ne.s32.totalorder %s614_s14, %s610_s13  ;;  %p25_p13 = scmp.eq.s32.totalorder %s24_s6, 0 }
  0x12   : > { %404 = dma.hbm_to_vmem [thread:$0]  (!%p402_p11), %s132_s22, 32, %s134_s25, [#allocation6]  }
  0x13   : > { %407 = dma.hbm_to_vmem [thread:$0]  (!%p402_p11), %s144_s28, 32, %s146_s30, [#allocation6]  }
  0x14   : > { %p35_p0 = scmp.eq.s32.totalorder %s618_s15, 0  ;;  %p708_p3 = por %p106_p2, %p34_p12 }
  0x15   : > { %p418_p5 = scmp.lt.s32.totalorder %s618_s15, 2  ;;  %s156_s9 = sand.u32 1, %s614_s14  }
  0x16   : > { %s714_s8 = scalar_select %p25_p13, %s614_s14, %s27_s5  }
  0x17   : > { %p36_p7 = por %p35_p0, %p34_p12  ;;  %s374_s10 = sshll.u32 %s156_s9, 4 }
  0x18   : > { %s387_s11 = sshll.u32 %s618_s15, 4  ;;  %s160_s22 = scalar_lea.vmem [#allocation2], %s374_s10 }
  0x19   : > { %s165_s21 = scalar_lea.hbm %s787_s0, %s387_s11  ;;  %s169_s24 = sshll.u32 %s160_s22, 4  ;;  %s170_s24 = int_to_ptr.vmem [resolvable:$true] %s169_s24 }
  0x1a   : > { %s167_s25 = sshll.u32 %s165_s21, 4  ;;  %p721_p2 = pnand %p418_p5, %p36_p7  ;;  %s168_s25 = int_to_ptr.hbm [resolvable:$true] %s167_s25 }
  0x1b   : > { %s157_s27 = scalar_lea.sflag [#allocation3], %s156_s9  ;;  %s518_s28 = sshra.s32 %s168_s25, 4  ;;  %s519_s28 = int_to_ptr.hbm [resolvable:$true] %s518_s28 }
  0x1c   : > { %s520_s29 = scalar_lea.hbm %s519_s28, 16  ;;  %p522_p11 = pneg %p721_p2 }
  0x1d   : > { %p521_p10 = scmp.ne.s32.totalorder %s519_s28, %s520_s29  ;;  %s525_s6 = scalar_lea.hbm %s787_s0, 32 }
  0x1e   : > { %p526_p0 = scmp.lt.s32.totalorder %s519_s28, %s787_s0  ;;  %p527_p5 = scmp.lt.s32.totalorder %s525_s6, %s520_s29 }
  0x1f   : > { %p523_p12 = pnand %p522_p11, %p521_p10 }
  0x20   : > { %p528_p7 = por %p527_p5, %p526_p0 }
  0x21   : > { %p524_p13 = pneg %p523_p12 }
  0x23   : > { %p529_p9 = pnand %p528_p7, %p524_p13 }
  0x25   : > { %532 = shalt.err (!%p529_p9)
}
  0x26   : > { %411 = dma.hbm_to_vmem [thread:$0]  (!%p721_p2), %s168_s25, 256, %s170_s24, %s157_s27  }
  0x27   : > { %178 = sbr.rel (%p685_p8) target bundleno = 322 (0x142), region = 32  ;;  %s738_s9 = sand.u32 (!%p685_p8), 1, %s610_s13  }
  0x28   : > { %s378_s17 = sshll.u32 (!%p685_p8), %s738_s9, 4  ;;  %s181_s20 = scalar_lea.sflag (!%p685_p8), [#allocation3], %s738_s9 }
  0x29   : > { %s184_s21 = scalar_lea.vmem (!%p685_p8), [#allocation2], %s378_s17 }
  0x2c   : > { %593 = dma.done.wait (%p672_p4), %s181_s20, 256  }
  0x2d   : > { %595 = vsyncadd (%p672_p4), %s181_s20, 4294967040 }
  0x2e   : > { %597 = dma.done.wait (%p41_p1), [#allocation6], 64  }
  0x2f   : > { %599 = vsyncadd (%p41_p1), [#allocation6], 4294967232  ;;  %v218_v0 = vld [vmem:[%s184_s21] sm:$0xff]  ;;  %v219_v1 = vld [vmem:[%s184_s21 + $0x8] sm:$0xff]  ;;  %s388_s18 = sshll.u32 %s663_s16, 4  ;;  %s217_s16 = scalar_lea.vmem [#allocation8], %s378_s17 }
  0x30   : > { %v220_v2 = vadd.f32 %v219_v1, %v218_v0  ;;  %v245_v17 = vld [vmem:[#allocation5] sm:$0x3]  ;;  %v253_v20 = vld [vmem:[#allocation7] sm:$0x3]  ;;  %s275_s24 = scalar_lea.hbm %s790_s3, %s388_s18  ;;  %s277_s25 = sshll.u32 %s217_s16, 4  ;;  %s278_s25 = int_to_ptr.vmem [resolvable:$true] %s277_s25 }
  0x31   : > { %v247_v21 = vperm.slane %v245_v17, 0  ;;  %v248_v22 = vperm.slane %v245_v17, 1  ;;  %v255_v26 = vperm.slane %v253_v20, 0  ;;  %v256_v27 = vperm.slane %v253_v20, 1  ;;  %s279_s26 = sshll.u32 %s275_s24, 4  ;;  %s264_s27 = scalar_lea.sflag [#allocation4], %s738_s9  ;;  %s280_s26 = int_to_ptr.hbm [resolvable:$true] %s279_s26 }
  0x32   : > { %221 = vadd.xlane.f32.xlu0 %v220_v2  ;;  %s562_s28 = sshra.s32 %s280_s26, 4  ;;  %s568_s6 = scalar_lea.hbm %s790_s3, 32  ;;  %s563_s28 = int_to_ptr.hbm [resolvable:$true] %s562_s28 }
  0x33   : > { %s564_s29 = scalar_lea.hbm %s563_s28, 16  ;;  %p569_p9 = scmp.lt.s32.totalorder %s563_s28, %s790_s3 }
  0x34   : > { %p565_p1 = scmp.ne.s32.totalorder %s563_s28, %s564_s29  ;;  %p570_p2 = scmp.lt.s32.totalorder %s568_s6, %s564_s29 }
  0x36   : > { %p566_p4 = pnand %p565_p1, %p708_p3  ;;  %p571_p10 = por %p570_p2, %p569_p9 }
  0x38   : > { %p567_p8 = pneg %p566_p4 }
  0x3a   : > { %p572_p11 = pnand %p571_p10, %p567_p8 }
  0xa5   : > { %v222_v3 = vpop.xlane.xlu0 %221 }
  0xa6   : > { %v223_v4 = vmul.f32 0.00390625, %v222_v3 }
  0xa8   : > { %v224_v5 = vsub.f32 %v218_v0, %v223_v4  ;;  %v225_v6 = vsub.f32 %v219_v1, %v223_v4 }
  0xaa   : > { %v226_v7 = vmul.f32 %v224_v5, %v224_v5  ;;  %v227_v8 = vmul.f32 %v225_v6, %v225_v6 }
  0xac   : > { %v228_v9 = vadd.f32 %v227_v8, %v226_v7 }
  0xae   : > { %229 = vadd.xlane.f32.xlu0 %v228_v9 }
 0x121   : > { %v230_v10 = vpop.xlane.xlu0 %229 }
 0x122   : > { %v231_v11 = vmul.f32 0.00390625, %v230_v10 }
 0x124   : > { %v232_v12 = vadd.f32 1e-12, %v231_v11 }
 0x126   : > { %456 = vrsqrt.f32 %v232_v12  ;;  %vm239_vm1 = vweird.f32 %v232_v12 }
 0x12c   : > { %v457_v13 = vpop.eup %456 }
 0x12d   : > { %v234_v14 = vmul.f32 %v457_v13, %v232_v12  ;;  %vm240_vm0 = vweird.f32 %v457_v13 }
 0x12e   : > { %vm241_vm2 = vmor %vm239_vm1, %vm240_vm0 }
 0x12f   : > { %v235_v15 = vmul.f32 %v457_v13, %v234_v14 }
 0x131   : > { %v236_v16 = vmul.f32 0.5, %v235_v15 }
 0x133   : > { %v237_v18 = vsub.f32 1.5, %v236_v16 }
 0x135   : > { %v238_v19 = vmul.f32 %v457_v13, %v237_v18 }
 0x137   : > { %v242_v23 = vsel %vm241_vm2, %v457_v13, %v238_v19 }
 0x138   : > { %v243_v24 = vmul.f32 %v242_v23, %v224_v5  ;;  %v244_v25 = vmul.f32 %v242_v23, %v225_v6 }
 0x13a   : > { %v251_v28 = vmul.f32 %v247_v21, %v243_v24  ;;  %v252_v29 = vmul.f32 %v248_v22, %v244_v25 }
 0x13c   : > { %v259_v30 = vadd.f32 %v255_v26, %v251_v28  ;;  %v260_v31 = vadd.f32 %v256_v27, %v252_v29 }
 0x13e   : > { %261 = vst [vmem:[%s217_s16] sm:$0xff] %v259_v30 }
 0x13f   : > { %262 = vst [vmem:[%s217_s16 + $0x8] sm:$0xff] %v260_v31 }
 0x140   : > { %575 = shalt.err (!%p572_p11)
}
 0x141   : > { %399 = dma.vmem_to_hbm [thread:$0]  (%p708_p3), %s278_s25, 256, %s280_s26, %s264_s27  }
 0x142 PF: > { %s291_s9 = sand.u32 1, %s606_s12   ;;  %p796_p12 = scmp.ge.s32.totalorder %s618_s15, 2 }
 0x143   : > { %s292_s17 = scalar_lea.sflag [#allocation4], %s291_s9 }
 0x144   : > { %p413_p13 = pnand %p796_p12, %p677_p6 }
 0x146   : > { %p414_p0 = pneg %p413_p13 }
 0x148   : > { %601 = dma.done.wait (%p414_p0), %s292_s17, 256  }
 0x149   : > { %603 = vsyncadd (%p414_p0), %s292_s17, 4294967040  ;;  %p17_p5 = scmp.ge.s32.totalorder %s698_s4, 4   ;;  %s797_s12 = smov %s610_s13 }
 0x14a   : > { %s798_s13 = smov %s614_s14  ;;  %s799_s14 = smov %s714_s8 }
 0x14b   : > { %s800_s15 = smov %s698_s4  ;;  %19 = sbr.rel (!%p17_p5) target bundleno = 6 (0x6), region = 85 }
 0x150   :  { %298 = vsyncpa [#allocation3], 1 }
 0x151   :  { %300 = vsyncpa [#allocation3 + $0x1], 1 }
 0x152   :  { %301 = vsyncpa [#allocation6], 1 }
 0x153   :  { %302 = vsyncpa [#allocation4], 1 }
 0x154   :  { %304 = vsyncpa [#allocation4 + $0x1], 1 }

</bundles_post_ra>
